<compile_context>
chip_gen: v6e
topology: v6e:2x2x1
jax: 0.10.0
libtpu: 0.0.40
codegen_flags: <defaults>
</compile_context>

<pallas_src>
import jax
import jax.numpy as jnp
from jax.experimental import pallas as pl
from jax.experimental.pallas import tpu as pltpu


def _round_up(n, m):
    return ((n + m - 1) // m) * m


def _mlp_kernel(x_ref, w1_ref, b1_ref, w2_ref, b2_ref, w3_ref, b3_ref, o_ref):
    # Layer 1: bf16 MXU matmul, f32 accumulate; bias/ReLU in f32.
    h1 = jnp.dot(x_ref[...], w1_ref[...], preferred_element_type=jnp.float32)
    h1 = jnp.maximum(h1 + b1_ref[...], 0.0)
    # Layer 2.
    h2 = jnp.dot(h1.astype(jnp.bfloat16), w2_ref[...],
                 preferred_element_type=jnp.float32)
    h2 = jnp.maximum(h2 + b2_ref[...], 0.0)
    # Layer 3: narrow (tile_b, out_size) result -> only useful bytes hit HBM.
    out = jnp.dot(h2.astype(jnp.bfloat16), w3_ref[...],
                  preferred_element_type=jnp.float32)
    o_ref[...] = out + b3_ref[...]


def _choose_tile_b(batch, tile_b_max=1024):
    """Balanced batch tiles; >=2 grid steps for large B (v7x megacore)."""
    if batch < 256:
        return batch                               # single block = whole batch
    n_tiles = max(2, pl.cdiv(batch, tile_b_max))   # at least 2 grid steps
    tile = _round_up(pl.cdiv(batch, n_tiles), 8)   # sublane-aligned tile
    return min(tile, tile_b_max)


def dnn_forward(x, params, *, tile_b=1024):
    """x: (B, input_size) float32; params: dict of f32 weights/biases."""
    w1, b1 = params["w1"], params["b1"]
    w2, b2 = params["w2"], params["b2"]
    w3, b3 = params["w3"], params["b3"]

    B, in_size = x.shape
    h1_size = w1.shape[1]
    h2_size = w2.shape[1]
    out_size = w3.shape[1]

    # bf16 matmul operands (weights resident in VMEM as bf16; x read as bf16).
    xb = x.astype(jnp.bfloat16)
    w1b = w1.astype(jnp.bfloat16)
    w2b = w2.astype(jnp.bfloat16)
    w3b = w3.astype(jnp.bfloat16)

    tile_b = _choose_tile_b(B, tile_b)
    grid_b = pl.cdiv(B, tile_b)    # ragged tail handled via Pallas partial blocks

    flops = 2 * B * (in_size * h1_size + h1_size * h2_size + h2_size * out_size)
    bytes_accessed = (xb.size * 2
                      + (w1b.size + w2b.size + w3b.size) * 2
                      + (b1.size + b2.size + b3.size) * 4
                      + B * out_size * 4)

    out = pl.pallas_call(
        _mlp_kernel,
        out_shape=jax.ShapeDtypeStruct((B, out_size), jnp.float32),
        grid=(grid_b,),
        in_specs=[
            pl.BlockSpec((tile_b, in_size), lambda i: (i, 0)),    # x tile (bf16)
            pl.BlockSpec((in_size, h1_size), lambda i: (0, 0)),   # w1 (resident)
            pl.BlockSpec((1, h1_size), lambda i: (0, 0)),         # b1
            pl.BlockSpec((h1_size, h2_size), lambda i: (0, 0)),   # w2
            pl.BlockSpec((1, h2_size), lambda i: (0, 0)),         # b2
            pl.BlockSpec((h2_size, out_size), lambda i: (0, 0)),  # w3
            pl.BlockSpec((1, out_size), lambda i: (0, 0)),        # b3
        ],
        out_specs=pl.BlockSpec((tile_b, out_size), lambda i: (i, 0)),
        compiler_params=pltpu.CompilerParams(
            dimension_semantics=("parallel",)),
        cost_estimate=pl.CostEstimate(
            flops=flops, transcendentals=0, bytes_accessed=bytes_accessed),
    )(xb, w1b, b1, w2b, b2, w3b, b3)

    return out


def init_params(key, input_size, hidden_sizes, output_size):
    """Deterministic init mimicking PyTorch nn.Linear default
    (uniform(-1/sqrt(fan_in), 1/sqrt(fan_in)) for both W and b)."""
    sizes = [input_size] + list(hidden_sizes) + [output_size]
    params = {}
    for i in range(len(sizes) - 1):
        fan_in, fan_out = sizes[i], sizes[i + 1]
        key, kw, kb = jax.random.split(key, 3)
        bound = 1.0 / jnp.sqrt(fan_in)
        # stored (in, out) so the kernel does x @ W
        params[f"w{i + 1}"] = jax.random.uniform(
            kw, (fan_in, fan_out), jnp.float32, -bound, bound)
        params[f"b{i + 1}"] = jax.random.uniform(
            kb, (1, fan_out), jnp.float32, -bound, bound)
    return params


def dnn_reference_f32(x, params):
    """Pure-JAX f32 reference (loose check)."""
    h = jnp.maximum(x @ params["w1"] + params["b1"], 0.0)
    h = jnp.maximum(h @ params["w2"] + params["b2"], 0.0)
    return h @ params["w3"] + params["b3"]


def dnn_reference_bf16(x, params):
    """Pure-JAX reference matching the kernel's bf16-matmul / f32-acc path."""
    bf16 = jnp.bfloat16

    def dot(a, b):
        return jnp.dot(a.astype(bf16), b.astype(bf16),
                       preferred_element_type=jnp.float32)

    h = jnp.maximum(dot(x, params["w1"]) + params["b1"], 0.0)
    h = jnp.maximum(dot(h, params["w2"]) + params["b2"], 0.0)
    return dot(h, params["w3"]) + params["b3"]


def _check(x, params):
    out = jax.block_until_ready(dnn_forward(x, params))
    assert out.shape == (x.shape[0], params["w3"].shape[1]), out.shape

    # Tight check against a bf16-matmul / f32-accumulate reference.
    ref_bf16 = dnn_reference_bf16(x, params)
    assert jnp.allclose(out, ref_bf16, atol=1e-4, rtol=1e-4), \
        f"max diff vs bf16 ref {jnp.max(jnp.abs(out - ref_bf16))}"

    # Loose sanity check against the full-f32 reference.
    ref_f32 = dnn_reference_f32(x, params)
    assert jnp.allclose(out, ref_f32, atol=3e-2, rtol=3e-2), \
        f"max diff vs f32 ref {jnp.max(jnp.abs(out - ref_f32))}"


if __name__ == "__main__":
    hidden_size = (128, 128)   # module-level global in the reference
    input_size = 8
    output_size = 1

    key = jax.random.PRNGKey(0)
    k_x, k_p, k_x2 = jax.random.split(key, 3)
    params = init_params(k_p, input_size, hidden_size, output_size)

    # Small demo batch (single-tile path).
    x_small = jax.random.normal(k_x, (8, input_size), dtype=jnp.float32)
    _check(x_small, params)

    # Ragged multi-tile path (2 grid steps, partial last block, masked store).
    x_ragged = jax.random.normal(k_x2, (300, input_size), dtype=jnp.float32)
    _check(x_ragged, params)

    print("KERNEL_OK")
</pallas_src>

<mosaic_0001>
module attributes {stable_mosaic.version = 11 : i64} {
  func.func @_mlp_kernel(%arg0: i32, %arg1: memref<8x8xbf16, #tpu.memory_space<vmem>>, %arg2: memref<8x128xbf16, #tpu.memory_space<vmem>>, %arg3: memref<1x128xf32, #tpu.memory_space<vmem>>, %arg4: memref<128x128xbf16, #tpu.memory_space<vmem>>, %arg5: memref<1x128xf32, #tpu.memory_space<vmem>>, %arg6: memref<128x1xbf16, #tpu.memory_space<vmem>>, %arg7: memref<1x1xf32, #tpu.memory_space<vmem>>, %arg8: memref<8x1xf32, #tpu.memory_space<vmem>>) attributes {dimension_semantics = [#tpu.dimension_semantics<parallel>], iteration_bounds = array<i64: 1>, scalar_prefetch = 0 : i64, scratch_operands = 0 : i64, tpu.core_type = #tpu.core_type<tc>, window_params = [{transform_indices = @transform_0, window_bounds = array<i64: 8, 8>}, {pipeline_mode = #tpu.pipeline_mode<synchronous>, transform_indices = @transform_1, window_bounds = array<i64: 8, 128>}, {pipeline_mode = #tpu.pipeline_mode<synchronous>, transform_indices = @transform_2, window_bounds = array<i64: 1, 128>}, {pipeline_mode = #tpu.pipeline_mode<synchronous>, transform_indices = @transform_3, window_bounds = array<i64: 128, 128>}, {pipeline_mode = #tpu.pipeline_mode<synchronous>, transform_indices = @transform_4, window_bounds = array<i64: 1, 128>}, {pipeline_mode = #tpu.pipeline_mode<synchronous>, transform_indices = @transform_5, window_bounds = array<i64: 128, 1>}, {pipeline_mode = #tpu.pipeline_mode<synchronous>, transform_indices = @transform_6, window_bounds = array<i64: 1, 1>}, {transform_indices = @transform_7, window_bounds = array<i64: 8, 1>}]} {
    %c0 = arith.constant 0 : index
    %c0_0 = arith.constant 0 : index
    %0 = vector.load %arg1[%c0, %c0_0] : memref<8x8xbf16, #tpu.memory_space<vmem>>, vector<8x8xbf16>
    %c0_1 = arith.constant 0 : index
    %c0_2 = arith.constant 0 : index
    %1 = vector.load %arg2[%c0_1, %c0_2] : memref<8x128xbf16, #tpu.memory_space<vmem>>, vector<8x128xbf16>
    %cst = arith.constant dense<0.000000e+00> : vector<8x128xf32>
    %2 = tpu.matmul %0, %1, %cst {dimension_numbers = #tpu.dot_dimension_numbers<[1], [0], [0], [1], [0, 0, 1, 1], [], []>} : vector<8x8xbf16>, vector<8x128xbf16>, vector<8x128xf32> -> vector<8x128xf32>
    %c0_3 = arith.constant 0 : index
    %c0_4 = arith.constant 0 : index
    %3 = vector.load %arg3[%c0_3, %c0_4] : memref<1x128xf32, #tpu.memory_space<vmem>>, vector<1x128xf32>
    %4 = vector.broadcast %3 : vector<1x128xf32> to vector<8x128xf32>
    %5 = arith.addf %2, %4 : vector<8x128xf32>
    %cst_5 = arith.constant 0.000000e+00 : f32
    %6 = vector.broadcast %cst_5 : f32 to vector<8x128xf32>
    %7 = arith.maximumf %5, %6 : vector<8x128xf32>
    %8 = arith.truncf %7 : vector<8x128xf32> to vector<8x128xbf16>
    %c0_6 = arith.constant 0 : index
    %c0_7 = arith.constant 0 : index
    %9 = vector.load %arg4[%c0_6, %c0_7] : memref<128x128xbf16, #tpu.memory_space<vmem>>, vector<128x128xbf16>
    %cst_8 = arith.constant dense<0.000000e+00> : vector<8x128xf32>
    %10 = tpu.matmul %8, %9, %cst_8 {dimension_numbers = #tpu.dot_dimension_numbers<[1], [0], [0], [1], [0, 0, 1, 1], [], []>} : vector<8x128xbf16>, vector<128x128xbf16>, vector<8x128xf32> -> vector<8x128xf32>
    %c0_9 = arith.constant 0 : index
    %c0_10 = arith.constant 0 : index
    %11 = vector.load %arg5[%c0_9, %c0_10] : memref<1x128xf32, #tpu.memory_space<vmem>>, vector<1x128xf32>
    %12 = vector.broadcast %11 : vector<1x128xf32> to vector<8x128xf32>
    %13 = arith.addf %10, %12 : vector<8x128xf32>
    %cst_11 = arith.constant 0.000000e+00 : f32
    %14 = vector.broadcast %cst_11 : f32 to vector<8x128xf32>
    %15 = arith.maximumf %13, %14 : vector<8x128xf32>
    %16 = arith.truncf %15 : vector<8x128xf32> to vector<8x128xbf16>
    %c0_12 = arith.constant 0 : index
    %c0_13 = arith.constant 0 : index
    %17 = vector.load %arg6[%c0_12, %c0_13] : memref<128x1xbf16, #tpu.memory_space<vmem>>, vector<128x1xbf16>
    %cst_14 = arith.constant dense<0.000000e+00> : vector<8x1xf32>
    %18 = tpu.matmul %16, %17, %cst_14 {dimension_numbers = #tpu.dot_dimension_numbers<[1], [0], [0], [1], [0, 0, 1, 1], [], []>} : vector<8x128xbf16>, vector<128x1xbf16>, vector<8x1xf32> -> vector<8x1xf32>
    %c0_15 = arith.constant 0 : index
    %c0_16 = arith.constant 0 : index
    %19 = vector.load %arg7[%c0_15, %c0_16] : memref<1x1xf32, #tpu.memory_space<vmem>>, vector<1x1xf32>
    %20 = vector.broadcast %19 : vector<1x1xf32> to vector<8x1xf32>
    %21 = arith.addf %18, %20 : vector<8x1xf32>
    %c0_17 = arith.constant 0 : index
    %c0_18 = arith.constant 0 : index
    %22 = vector.load %arg8[%c0_17, %c0_18] : memref<8x1xf32, #tpu.memory_space<vmem>>, vector<8x1xf32>
    tpu.vector_store %arg8[%c0_17, %c0_18], %21 {strides = array<i32>} : memref<8x1xf32, #tpu.memory_space<vmem>>, vector<8x1xf32>,
    return
  }
  func.func @transform_0(%arg0: i32) -> (i32, i32) {
    %c0_i32 = arith.constant 0 : i32
    %c0_i32_0 = arith.constant 0 : i32
    return %arg0, %c0_i32 : i32, i32
  }
  func.func @transform_1(%arg0: i32) -> (i32, i32) {
    %c0_i32 = arith.constant 0 : i32
    %c0_i32_0 = arith.constant 0 : i32
    %c0_i32_1 = arith.constant 0 : i32
    return %c0_i32, %c0_i32_0 : i32, i32
  }
  func.func @transform_2(%arg0: i32) -> (i32, i32) {
    %c0_i32 = arith.constant 0 : i32
    %c0_i32_0 = arith.constant 0 : i32
    %c0_i32_1 = arith.constant 0 : i32
    return %c0_i32, %c0_i32_0 : i32, i32
  }
  func.func @transform_3(%arg0: i32) -> (i32, i32) {
    %c0_i32 = arith.constant 0 : i32
    %c0_i32_0 = arith.constant 0 : i32
    %c0_i32_1 = arith.constant 0 : i32
    return %c0_i32, %c0_i32_0 : i32, i32
  }
  func.func @transform_4(%arg0: i32) -> (i32, i32) {
    %c0_i32 = arith.constant 0 : i32
    %c0_i32_0 = arith.constant 0 : i32
    %c0_i32_1 = arith.constant 0 : i32
    return %c0_i32, %c0_i32_0 : i32, i32
  }
  func.func @transform_5(%arg0: i32) -> (i32, i32) {
    %c0_i32 = arith.constant 0 : i32
    %c0_i32_0 = arith.constant 0 : i32
    %c0_i32_1 = arith.constant 0 : i32
    return %c0_i32, %c0_i32_0 : i32, i32
  }
  func.func @transform_6(%arg0: i32) -> (i32, i32) {
    %c0_i32 = arith.constant 0 : i32
    %c0_i32_0 = arith.constant 0 : i32
    %c0_i32_1 = arith.constant 0 : i32
    return %c0_i32, %c0_i32_0 : i32, i32
  }
  func.func @transform_7(%arg0: i32) -> (i32, i32) {
    %c0_i32 = arith.constant 0 : i32
    %c0_i32_0 = arith.constant 0 : i32
    return %arg0, %c0_i32 : i32, i32
  }
}

</mosaic_0001>

<bundles_post_ra>
// kernel: tpu_custom_call.1
= control target key start
LH: loop header
LB: loop body
LE: loop exit
PB: predicated region body
PF: predicated region fallthrough
CT: control target
= control target key end

     0   :  { %s590_s0 = inlined_call_operand.vmem [shape: bf16[8,8], index: 0, kind: input, shape index: {}]   ;;  %s591_s1 = inlined_call_operand.vmem [shape: bf16[8,128], index: 1, kind: input, shape index: {}]   ;;  %s592_s2 = inlined_call_operand.hbm [shape: f32[1,128], index: 2, kind: input, shape index: {}]   ;;  %s593_s3 = inlined_call_operand.vmem [shape: bf16[128,128], index: 3, kind: input, shape index: {}]   ;;  %s594_s4 = inlined_call_operand.vmem [shape: f32[1,128], index: 4, kind: input, shape index: {}]   ;;  %s595_s5 = inlined_call_operand.vmem [shape: bf16[128,1], index: 5, kind: input, shape index: {}]   ;;  %s596_s6 = inlined_call_operand.<no memory space> [shape: f32[1,1], index: 6, kind: input, shape index: {}]   ;;  %s597_s7 = inlined_call_operand.vmem [shape: f32[8,1], index: 7, kind: output, shape index: {}]  }
   0x1   :  { %v12_v0 = vstv %s596_s6 }
   0x2   :  { %13 = vst [vmem:[#allocation2] sm:$0x1] %v12_v0 }
   0x3   :  { %14 = vsyncpa [#allocation4], 0  ;;  %s458_s26 = smov [#allocation3]  }
   0x4   :  { %s25_s27 = sshll.u32 %s458_s26, 4  ;;  %s26_s27 = int_to_ptr.vmem [resolvable:$true] %s25_s27 }
   0x5   :  { %s444_s28 = scalar_lea.vmem %s26_s27, 16  ;;  %s448_s29 = scalar_lea.vmem %s26_s27, 32 }
   0x6   :  { %p445_p0 = scmp.ne.s32.totalorder %s26_s27, %s444_s28  ;;  %p449_p1 = scmp.lt.s32.totalorder %s26_s27, %s26_s27 }
   0x7   :  { %p450_p2 = scmp.lt.s32.totalorder %s448_s29, %s444_s28 }
   0x9   :  { %p451_p3 = por %p450_p2, %p449_p1 }
   0xb   :  { %p452_p4 = pnand %p451_p3, %p445_p0 }
   0xd   :  { %455 = shalt.err (!%p452_p4)
}
   0xe   :  { %28 = dma.hbm_to_vmem [thread:$0]  %s592_s2, 16, %s26_s27, [#allocation4]  }
   0xf   :  { %456 = dma.done.wait [#allocation4], 16  }
  0x10   :  { %457 = vsyncadd [#allocation4], 4294967280  ;;  %v459_v1 = vmov 0.0   ;;  %vm460_vm0 = vmmov 0   ;;  %vm54_vm1 = vcmask 1043456   ;;  %vm50_vm2 = vcmask 64512  }
  0x11   :  { %371 = vmatprep.subr.bf16.mxu0 %v459_v1  ;;  %373 = vmatprep.mubr.msk.bf16.mxu0 %vm460_vm0, %v459_v1  ;;  %v42_v2 = vld [vmem:[%s591_s1] sm:$0xf]  ;;  %v420_v4 = vld [vmem:[%s593_s3 + $0x38] sm:$0xff]   ;;  %v421_v6 = vld [vmem:[%s593_s3 + $0x30] sm:$0xff]   ;;  %vm324_vm3 = vcmask 7168  }
  0x12   :  { %377 = vmatprep.subr.bf16.mxu1 %v459_v1  ;;  %393 = vmatprep.mubr.msk.bf16.mxu1 %vm460_vm0, %v459_v1  ;;  %v56_v3 = vsel %vm54_vm1, %v42_v2, 0  ;;  %v41_v5 = vld [vmem:[%s590_s0] sm:$0xf]  ;;  %v422_v7 = vld [vmem:[%s593_s3 + $0x28] sm:$0xff]   ;;  %v424_v9 = vld [vmem:[%s593_s3 + $0x18] sm:$0xff]  }
  0x13   :  { %372 = vmatpush3.bf16.msra.mxu0 %v56_v3  ;;  %378 = vmatpush3.bf16.msra.mxu1 %v420_v4  ;;  %v423_v8 = vld [vmem:[%s593_s3 + $0x20] sm:$0xff]   ;;  %v425_v10 = vld [vmem:[%s593_s3 + $0x10] sm:$0xff]   ;;  %v426_v11 = vld [vmem:[%s593_s3 + $0x8] sm:$0xff]  }
  0x14   :  { %397 = vmatprep.subr.bf16.mxu0 %v459_v1  ;;  %379 = vmatprep.subr.bf16.mxu1 %v459_v1  ;;  %v427_v12 = vld [vmem:[%s593_s3] sm:$0xff]   ;;  %v428_v13 = vld [vmem:[%s595_s5 + $0x38] sm:$0xff]   ;;  %v429_v14 = vld [vmem:[%s595_s5 + $0x30] sm:$0xff]  }
  0x15   :  { %v430_v15 = vld [vmem:[%s595_s5 + $0x28] sm:$0xff]   ;;  %v431_v16 = vld [vmem:[%s595_s5 + $0x20] sm:$0xff]   ;;  %v432_v17 = vld [vmem:[%s595_s5 + $0x18] sm:$0xff]  }
  0x16   :  { %374 = vmatmul.mubr.msk.bf16.vlgmr.msra.gmra.mxu0 %vm50_vm2, %v41_v5  ;;  %v433_v18 = vld [vmem:[%s595_s5 + $0x10] sm:$0xff]   ;;  %v331_v19 = vld [vmem:[#allocation3] ss:$0 sm:$0xff]  ;;  %v434_v27 = vld [vmem:[%s595_s5 + $0x8] sm:$0xff]  }
  0x17   :  { %413 = vmatprep.mubr.msk.bf16.mxu0 %vm460_vm0, %v459_v1  ;;  %380 = vmatpush3.bf16.msra.mxu1 %v421_v6  ;;  %v435_v28 = vld [vmem:[%s595_s5] sm:$0xff]  }
  0x18   :  { %381 = vmatprep.subr.bf16.mxu1 %v459_v1  ;;  %398 = vmatpush3.bf16.msra.mxu0 %v428_v13  ;;  %v333_v29 = vld [vmem:[%s594_s4] ss:$0 sm:$0xff] }
  0x19   :  { %399 = vmatprep.subr.bf16.mxu0 %v459_v1  ;;  %v342_v37 = vld [vmem:[#allocation2] ss:$0 sm:$0xff] }
  0x1b   :  { %382 = vmatpush3.bf16.msra.mxu1 %v422_v7 }
  0x1c   :  { %383 = vmatprep.subr.bf16.mxu1 %v459_v1  ;;  %400 = vmatpush3.bf16.msra.mxu0 %v429_v14 }
  0x1d   :  { %401 = vmatprep.subr.bf16.mxu0 %v459_v1 }
  0x1f   :  { %384 = vmatpush3.bf16.msra.mxu1 %v423_v8 }
  0x20   :  { %385 = vmatprep.subr.bf16.mxu1 %v459_v1  ;;  %402 = vmatpush3.bf16.msra.mxu0 %v430_v15 }
  0x21   :  { %403 = vmatprep.subr.bf16.mxu0 %v459_v1 }
  0x23   :  { %386 = vmatpush3.bf16.msra.mxu1 %v424_v9 }
  0x24   :  { %387 = vmatprep.subr.bf16.mxu1 %v459_v1  ;;  %404 = vmatpush3.bf16.msra.mxu0 %v431_v16 }
  0x25   :  { %405 = vmatprep.subr.bf16.mxu0 %v459_v1 }
  0x27   :  { %388 = vmatpush3.bf16.msra.mxu1 %v425_v10 }
  0x28   :  { %389 = vmatprep.subr.bf16.mxu1 %v459_v1  ;;  %406 = vmatpush3.bf16.msra.mxu0 %v432_v17 }
  0x29   :  { %407 = vmatprep.subr.bf16.mxu0 %v459_v1 }
  0x2b   :  { %390 = vmatpush3.bf16.msra.mxu1 %v426_v11 }
  0x2c   :  { %391 = vmatprep.subr.bf16.mxu1 %v459_v1  ;;  %408 = vmatpush3.bf16.msra.mxu0 %v433_v18 }
  0x2d   :  { %409 = vmatprep.subr.bf16.mxu0 %v459_v1 }
  0x2f   :  { %392 = vmatpush3.bf16.msra.mxu1 %v427_v12 }
  0x30   :  { %410 = vmatpush3.bf16.msra.mxu0 %v434_v27 }
  0x31   :  { %411 = vmatprep.subr.bf16.mxu0 %v459_v1 }
  0x34   :  { %412 = vmatpush3.bf16.msra.mxu0 %v435_v28 }
  0xd6   :  { %v92_v20 = vpop.f32.mrf.mxu0 }
  0xd7   :  { %v93_v21 = vadd.f32 %v331_v19, %v92_v20 }
  0xd8   :  { %v375_v22 = vpop.f32.mrf.mxu0 }
  0xd9   :  { %v98_v23 = vmax.f32 %v93_v21, 0.0 }
  0xda   :  { %v95_v24 = vpop.f32.mrf.mxu0 }
  0xdb   :  { %v99_v25 = vpack.c.bf16 %v98_v23, %v98_v23 }
  0xdc   :  { %v376_v26 = vpop.f32.mrf.mxu0 }
  0xdd   :  { %394 = vmatmul.mubr.bf16.vlgmr.msra.gmra.mxu1 %v99_v25 }
 0x19d   :  { %v205_v30 = vpop.f32.mrf.mxu1 }
 0x19e   :  { %v206_v31 = vadd.f32 %v333_v29, %v205_v30 }
 0x19f   :  { %v395_v32 = vpop.f32.mrf.mxu1 }
 0x1a0   :  { %v211_v33 = vmax.f32 %v206_v31, 0.0 }
 0x1a1   :  { %v208_v34 = vpop.f32.mrf.mxu1 }
 0x1a2   :  { %v212_v35 = vpack.c.bf16 %v211_v33, %v211_v33 }
 0x1a3   :  { %v396_v36 = vpop.f32.mrf.mxu1 }
 0x1a4   :  { %414 = vmatmul.mubr.bf16.vlgmr.msra.gmra.mxu0 %v212_v35 }
 0x264   :  { %v318_v38 = vpop.f32.mrf.mxu0 }
 0x265   :  { %v319_v39 = vadd.f32 %v342_v37, %v318_v38 }
 0x266   :  { %v415_v40 = vpop.f32.mrf.mxu0 }
 0x267   :  { %325 = vst.msk [vmem:[%s597_s7] sm:$0xff] %vm324_vm3, %v319_v39 }
 0x268   :  { %v321_v41 = vpop.f32.mrf.mxu0 }
 0x26a   :  { %v416_v42 = vpop.f32.mrf.mxu0 }
 0x26b   :  { %330 = vsyncpa [#allocation4], 1 }

</bundles_post_ra>
